<compile_context>
chip_gen: v6e
topology: v6e:2x2x1
jax: 0.10.0
libtpu: 0.0.40
codegen_flags: <defaults>
</compile_context>

<pallas_src>
import functools

import jax
import jax.numpy as jnp
from jax.experimental import pallas as pl
from jax.experimental.pallas import tpu as pltpu


# ----------------------------------------------------------------------------
# Kernels
# ----------------------------------------------------------------------------
def classifier_full_l_kernel(x_ref, w_ref, b_ref, o_ref, *, l_total):
    """Full-L path: one block holds the whole length axis. No scratch needed.

    x_ref: (tile_N, C, L) VMEM | w_ref: (C, 1) VMEM | b_ref: (1,) SMEM
    o_ref: (tile_N, 1) VMEM
    """
    x = x_ref[...].astype(jnp.float32)                        # (tile_N, C, L)
    s = jnp.sum(x, axis=-1)                                   # (tile_N, C)
    w_row = w_ref[...].astype(jnp.float32).reshape(1, -1)     # (1, C)
    y = jnp.sum(s * w_row, axis=1, keepdims=True)             # (tile_N, 1)
    y = y * (1.0 / l_total) + b_ref[0]                        # mean + conv bias
    o_ref[...] = jax.nn.sigmoid(y).astype(o_ref.dtype)


def classifier_tiled_kernel(x_ref, w_ref, b_ref, o_ref, acc_ref, *,
                            l_total, tile_l):
    """L-tiled path (long sequences): accumulate partial L-sums in f32 scratch.

    x_ref: (tile_N, C, tile_L) VMEM | acc_ref: (tile_N, C) f32 VMEM scratch
    """
    j = pl.program_id(1)
    nj = pl.num_programs(1)

    @pl.when(j == 0)
    def _init():
        acc_ref[...] = jnp.zeros_like(acc_ref)

    x = x_ref[...].astype(jnp.float32)                        # (tile_N, C, tile_L)

    if l_total % tile_l != 0:
        # Hot path: interior tiles are fully valid -> plain load + add.
        @pl.when(j < nj - 1)
        def _interior():
            acc_ref[...] += jnp.sum(x, axis=-1)

        # Cold path: only the last L-tile pays for masking (lane-only iota).
        @pl.when(j == nj - 1)
        def _boundary():
            lane = jax.lax.broadcasted_iota(jnp.int32, (1, 1, tile_l), 2)
            valid = (j * tile_l + lane) < l_total
            acc_ref[...] += jnp.sum(jnp.where(valid, x, 0.0), axis=-1)
    else:
        acc_ref[...] += jnp.sum(x, axis=-1)

    @pl.when(j == nj - 1)
    def _finalize():
        w_row = w_ref[...].astype(jnp.float32).reshape(1, -1)   # (1, C)
        y = jnp.sum(acc_ref[...] * w_row, axis=1, keepdims=True)
        y = y * (1.0 / l_total) + b_ref[0]
        o_ref[...] = jax.nn.sigmoid(y).astype(o_ref.dtype)


# ----------------------------------------------------------------------------
# Tiling / budget selection
# ----------------------------------------------------------------------------
def _round_up(v, m):
    return -(-v // m) * m


def _vmem_budgets():
    """(per-block budget, vmem_limit_bytes) sized for the local TPU generation."""
    cap = 64 * 1024 * 1024                       # conservative default (v7x per-TC)
    try:
        info = pltpu.get_tpu_info()
        cap = int(getattr(info, "vmem_capacity_bytes", cap)) or cap
    except Exception:
        pass
    if cap >= 100 * 1024 * 1024:                 # v5e / v6e: 128 MiB physical VMEM
        return 28 * 1024 * 1024, 80 * 1024 * 1024
    return 20 * 1024 * 1024, 48 * 1024 * 1024    # v7x: 64 MiB per TensorCore


def _choose_tiles(n, c, l, itemsize, tile_n, tile_l, block_budget):
    c_pad = _round_up(c, 8)

    # --- tile_L: prefer full L (contiguous DMA, no accumulator) -------------
    if tile_l is None:
        l_pad = _round_up(l, 128)
        if 8 * c_pad * l_pad * itemsize <= block_budget:
            tile_l = l                           # full-L path
        else:
            # L must be tiled: keep DMA segments >= 2 KiB.
            min_l = 512 if itemsize >= 4 else 1024
            tile_l = (block_budget // (8 * c_pad * itemsize) // 128) * 128
            tile_l = max(min_l, tile_l)
            tile_l = min(tile_l, (l // 128) * 128)
            if tile_l <= 0:
                tile_l = l
    else:
        tile_l = min(tile_l, l)
        if tile_l != l:
            tile_l = max(128, (tile_l // 128) * 128)

    l_block = tile_l if tile_l % 128 == 0 else _round_up(tile_l, 128)

    # --- tile_N: fill the per-block budget -----------------------------------
    if tile_n is None:
        tile_n = max(8, (block_budget // (c_pad * l_block * itemsize)) // 8 * 8)

    # Megacore: keep >= 2 N-tiles when the batch is big enough so the
    # "parallel" axis shards across both v7x TensorCores (harmless on 1-TC chips).
    if n >= 16:
        tile_n = min(tile_n, max(8, ((n // 2) // 8) * 8))

    if tile_n >= n:
        tile_n = n
    else:
        tile_n = min(max(8, (tile_n // 8) * 8), n)
    return int(tile_n), int(tile_l)


# ----------------------------------------------------------------------------
# Wrapper
# ----------------------------------------------------------------------------
def classifier_forward(x_ncl, w, b, *, tile_n=None, tile_l=None):
    """x_ncl: (N, C, L) exactly like the PyTorch module. Returns (N, 1, 1)."""
    n, c, l = x_ncl.shape
    itemsize = x_ncl.dtype.itemsize
    block_budget, vmem_limit = _vmem_budgets()
    tile_n, tile_l = _choose_tiles(n, c, l, itemsize, tile_n, tile_l, block_budget)

    cost = pl.CostEstimate(
        flops=2 * n * c * l,
        transcendentals=n,                               # one sigmoid per row
        bytes_accessed=n * c * l * itemsize + c * 4 + 4 + n * itemsize,
    )

    if tile_l == l:
        # ---------------- full-L path: 1-D grid over N -----------------------
        out = pl.pallas_call(
            functools.partial(classifier_full_l_kernel, l_total=l),
            out_shape=jax.ShapeDtypeStruct((n, 1), x_ncl.dtype),
            grid=(pl.cdiv(n, tile_n),),
            in_specs=[
                pl.BlockSpec((tile_n, c, l), lambda i: (i, 0, 0)),    # x (NCL)
                pl.BlockSpec((c, 1), lambda i: (0, 0)),               # w
                pl.BlockSpec(memory_space=pltpu.MemorySpace.SMEM),    # b
            ],
            out_specs=pl.BlockSpec((tile_n, 1), lambda i: (i, 0)),
            compiler_params=pltpu.CompilerParams(
                dimension_semantics=("parallel",),
                vmem_limit_bytes=vmem_limit,
            ),
            cost_estimate=cost,
        )(x_ncl, w, b)
    else:
        # ---------------- L-tiled path: (N-tiles, L-tiles) grid --------------
        # TODO(synk): if xprof shows DMA gaps at L-tile boundaries, sweep
        # pipeline_mode=pl.Buffered(3) on the x BlockSpec (VMEM permitting).
        out = pl.pallas_call(
            functools.partial(classifier_tiled_kernel, l_total=l, tile_l=tile_l),
            out_shape=jax.ShapeDtypeStruct((n, 1), x_ncl.dtype),
            grid=(pl.cdiv(n, tile_n), pl.cdiv(l, tile_l)),
            in_specs=[
                pl.BlockSpec((tile_n, c, tile_l), lambda i, j: (i, 0, j)),
                pl.BlockSpec((c, 1), lambda i, j: (0, 0)),
                pl.BlockSpec(memory_space=pltpu.MemorySpace.SMEM),
            ],
            out_specs=pl.BlockSpec((tile_n, 1), lambda i, j: (i, 0)),
            scratch_shapes=[pltpu.VMEM((tile_n, c), jnp.float32)],
            compiler_params=pltpu.CompilerParams(
                dimension_semantics=("parallel", "arbitrary"),
                vmem_limit_bytes=vmem_limit,
            ),
            cost_estimate=cost,
        )(x_ncl, w, b)

    return out.reshape(n, 1, 1)                 # match PyTorch (N, 1, 1)


def _reference(x, w, b):
    conv = jnp.einsum("ncl,co->nol", x, w) + b.reshape(1, 1, 1)      # (N, 1, L)
    return jax.nn.sigmoid(jnp.mean(conv, axis=2, keepdims=True))     # (N, 1, 1)


if __name__ == "__main__":
    # params.lstmnodes -> in_channels = lstmnodes*2 - 1
    lstmnodes = 16
    in_channels = lstmnodes * 2 - 1             # 31

    key = jax.random.PRNGKey(0)
    kx1, kx2, kx3, kw, kb = jax.random.split(key, 5)

    # Deterministic init mimicking Conv1d(in_channels, 1, 1) default bounds.
    bound = 1.0 / jnp.sqrt(jnp.float32(in_channels))
    w = jax.random.uniform(kw, (in_channels, 1), minval=-bound, maxval=bound,
                           dtype=jnp.float32)
    b = jax.random.uniform(kb, (1,), minval=-bound, maxval=bound,
                           dtype=jnp.float32)

    # Case 1: small shapes, auto tiles -> full-L single-tile path.
    x1 = jax.random.normal(kx1, (2, in_channels, 16), dtype=jnp.float32)
    out1 = jax.block_until_ready(classifier_forward(x1, w, b))
    ref1 = _reference(x1, w, b)
    assert out1.shape == (2, 1, 1)
    assert jnp.allclose(out1, ref1, atol=1e-5), (out1, ref1)

    # Case 2: forced L-tiling (tile_l=512, >=2 KiB f32 segments) with boundary
    # masking on both grid axes (N=12 -> partial N-tile, L=1000 -> partial L-tile).
    x2 = jax.random.normal(kx2, (12, in_channels, 1000), dtype=jnp.float32)
    out2 = jax.block_until_ready(classifier_forward(x2, w, b, tile_n=8, tile_l=512))
    ref2 = _reference(x2, w, b)
    assert out2.shape == (12, 1, 1)
    assert jnp.allclose(out2, ref2, atol=1e-5), (out2, ref2)

    # Case 3: auto tiles with N>=16 -> full-L path, >=2 N-tiles (megacore clamp).
    x3 = jax.random.normal(kx3, (16, in_channels, 300), dtype=jnp.float32)
    out3 = jax.block_until_ready(classifier_forward(x3, w, b))
    ref3 = _reference(x3, w, b)
    assert out3.shape == (16, 1, 1)
    assert jnp.allclose(out3, ref3, atol=1e-5), (out3, ref3)

    print("KERNEL_OK")
</pallas_src>

<mosaic_0001>
module attributes {stable_mosaic.version = 11 : i64} {
  func.func @classifier_full_l_kernel(%arg0: i32, %arg1: memref<2x31x16xf32, #tpu.memory_space<vmem>>, %arg2: memref<31x1xf32, #tpu.memory_space<vmem>>, %arg3: memref<1xf32, #tpu.memory_space<smem>>, %arg4: memref<2x1xf32, #tpu.memory_space<vmem>>) attributes {dimension_semantics = [#tpu.dimension_semantics<parallel>], iteration_bounds = array<i64: 1>, scalar_prefetch = 0 : i64, scratch_operands = 0 : i64, tpu.core_type = #tpu.core_type<tc>, window_params = [{transform_indices = @transform_0, window_bounds = array<i64: 2, 31, 16>}, {pipeline_mode = #tpu.pipeline_mode<synchronous>, transform_indices = @transform_1, window_bounds = array<i64: 31, 1>}, {transform_indices = @transform_2, window_bounds = array<i64: 1>}, {transform_indices = @transform_3, window_bounds = array<i64: 2, 1>}]} {
    %c0 = arith.constant 0 : index
    %c0_0 = arith.constant 0 : index
    %c0_1 = arith.constant 0 : index
    %0 = vector.load %arg1[%c0, %c0_0, %c0_1] : memref<2x31x16xf32, #tpu.memory_space<vmem>>, vector<2x31x16xf32>
    %cst = arith.constant dense<0.000000e+00> : vector<2x31xf32>
    %1 = vector.multi_reduction <add>, %0, %cst [2] : vector<2x31x16xf32> to vector<2x31xf32>
    %c0_2 = arith.constant 0 : index
    %c0_3 = arith.constant 0 : index
    %2 = vector.load %arg2[%c0_2, %c0_3] : memref<31x1xf32, #tpu.memory_space<vmem>>, vector<31x1xf32>
    %3 = vector.shape_cast %2 : vector<31x1xf32> to vector<1x31xf32>
    %4 = vector.broadcast %3 : vector<1x31xf32> to vector<2x31xf32>
    %5 = arith.mulf %1, %4 : vector<2x31xf32>
    %cst_4 = arith.constant dense<0.000000e+00> : vector<2xf32>
    %6 = vector.multi_reduction <add>, %5, %cst_4 [1] : vector<2x31xf32> to vector<2xf32>
    %7 = vector.shape_cast %6 : vector<2xf32> to vector<2x1xf32>
    %cst_5 = arith.constant 6.250000e-02 : f32
    %8 = vector.broadcast %cst_5 : f32 to vector<2x1xf32>
    %9 = arith.mulf %7, %8 : vector<2x1xf32>
    %c0_6 = arith.constant 0 : index
    %10 = memref.load %arg3[%c0_6] : memref<1xf32, #tpu.memory_space<smem>>
    %11 = vector.broadcast %10 : f32 to vector<2x1xf32>
    %12 = arith.addf %9, %11 : vector<2x1xf32>
    %13 = arith.negf %12 : vector<2x1xf32>
    %14 = math.exp %13 : vector<2x1xf32>
    %cst_7 = arith.constant 1.000000e+00 : f32
    %15 = vector.broadcast %cst_7 : f32 to vector<2x1xf32>
    %16 = arith.addf %15, %14 : vector<2x1xf32>
    %17 = arith.divf %15, %16 : vector<2x1xf32>
    %c0_8 = arith.constant 0 : index
    %c0_9 = arith.constant 0 : index
    %18 = vector.load %arg4[%c0_8, %c0_9] : memref<2x1xf32, #tpu.memory_space<vmem>>, vector<2x1xf32>
    tpu.vector_store %arg4[%c0_8, %c0_9], %17 {strides = array<i32>} : memref<2x1xf32, #tpu.memory_space<vmem>>, vector<2x1xf32>,
    return
  }
  func.func @transform_0(%arg0: i32) -> (i32, i32, i32) {
    %c0_i32 = arith.constant 0 : i32
    %c0_i32_0 = arith.constant 0 : i32
    %c0_i32_1 = arith.constant 0 : i32
    return %arg0, %c0_i32, %c0_i32_0 : i32, i32, i32
  }
  func.func @transform_1(%arg0: i32) -> (i32, i32) {
    %c0_i32 = arith.constant 0 : i32
    %c0_i32_0 = arith.constant 0 : i32
    %c0_i32_1 = arith.constant 0 : i32
    return %c0_i32, %c0_i32_0 : i32, i32
  }
  func.func @transform_2(%arg0: i32) -> i32 {
    %c0_i32 = arith.constant 0 : i32
    %c0_i32_0 = arith.constant 0 : i32
    return %c0_i32 : i32
  }
  func.func @transform_3(%arg0: i32) -> (i32, i32) {
    %c0_i32 = arith.constant 0 : i32
    %c0_i32_0 = arith.constant 0 : i32
    return %arg0, %c0_i32 : i32, i32
  }
}

</mosaic_0001>

<bundles_post_ra>
// kernel: tpu_custom_call.1
= control target key start
LH: loop header
LB: loop body
LE: loop exit
PB: predicated region body
PF: predicated region fallthrough
CT: control target
= control target key end

     0   :  { %vm23_vm0 = vcmask 130048   ;;  %vm33_vm1 = vcmask 129024   ;;  %v170_v16 = vmov 0   ;;  %v93_v39 = vlaneseq  ;;  %s239_s0 = inlined_call_operand.vmem [shape: f32[2,31,16], index: 0, kind: input, shape index: {}]   ;;  %s240_s1 = inlined_call_operand.vmem [shape: f32[31,1], index: 1, kind: input, shape index: {}]   ;;  %s241_s2 = inlined_call_operand.<no memory space> [shape: f32[1], index: 2, kind: input, shape index: {}]   ;;  %s242_s3 = inlined_call_operand.vmem [shape: f32[2,1], index: 3, kind: output, shape index: {}]  }
   0x1   :  { %v15_v0 = vld [vmem:[%s239_s0] sm:$0xff]  ;;  %v16_v1 = vld [vmem:[%s239_s0 + $0x8] sm:$0xff]  ;;  %v17_v8 = vld [vmem:[%s239_s0 + $0x10] sm:$0xff]  ;;  %164 = vset.pattern.permute.xlu0 %v170_v16  ;;  %165 = vset.pattern.permute.xlu1 %v170_v16  ;;  %vm104_vm2 = vcmask 130112   ;;  %vm111_vm3 = vcmask 195712   ;;  %vm118_vm4 = vcmask 261312  }
   0x2   :  { %v19_v2 = vld [vmem:[%s239_s0 + $0x20] sm:$0xff]  ;;  %v24_v3 = vsel %vm23_vm0, %v15_v0, 0.0  ;;  %v20_v5 = vld [vmem:[%s239_s0 + $0x28] sm:$0xff]  ;;  %v27_v6 = vsel %vm23_vm0, %v16_v1, 0.0  ;;  %v21_v9 = vld [vmem:[%s239_s0 + $0x30] sm:$0xff]  ;;  %v30_v10 = vsel %vm23_vm0, %v17_v8, 0.0 }
   0x3   :  { %v37_v4 = vsel %vm23_vm0, %v19_v2, 0.0  ;;  %25 = vadd.xlane.f32.xlu0 %v24_v3  ;;  %v40_v7 = vsel %vm23_vm0, %v20_v5, 0.0  ;;  %v43_v11 = vsel %vm23_vm0, %v21_v9, 0.0  ;;  %v18_v12 = vld [vmem:[%s239_s0 + $0x18] sm:$0x7f]  ;;  %v49_v17 = vld [vmem:[%s240_s1] sm:$0xff] }
   0x4   :  { %38 = vadd.xlane.f32.xlu1 %v37_v4  ;;  %v22_v13 = vld [vmem:[%s239_s0 + $0x38] sm:$0x7f]  ;;  %v34_v14 = vsel %vm33_vm1, %v18_v12, 0.0  ;;  %v50_v20 = vld [vmem:[%s240_s1 + $0x8] sm:$0xff]  ;;  %v51_v27 = vld [vmem:[%s240_s1 + $0x10] sm:$0xff]  ;;  %v94_v41 = vand.u32 127, %v93_v39 }
   0x5   :  { %v46_v15 = vsel %vm33_vm1, %v22_v13, 0.0  ;;  %v52_v32 = vld [vmem:[%s240_s1 + $0x18] sm:$0x7f]  ;;  %v96_v45 = vshrl.u32 %v93_v39, 7  ;;  %vm139_vm5 = vcmask 1041409   ;;  %vm142_vm6 = vcmask 246784  }
   0x6   :  { %v99_v43 = vadd.s32 4294967288, %v94_v41  ;;  %v106_v44 = vadd.s32 4294967280, %v94_v41  ;;  %v113_v46 = vadd.s32 4294967272, %v94_v41  ;;  %vm156_vm7 = vcmask 1024  }
   0x7   :  { %28 = vadd.xlane.f32.xlu0 %v27_v6  ;;  %v97_v50 = vsub.s32 %v94_v41, %v96_v45 }
   0x8   :  { %41 = vadd.xlane.f32.xlu1 %v40_v7  ;;  %v102_v48 = vsub.s32 %v99_v43, %v96_v45  ;;  %v109_v49 = vsub.s32 %v106_v44, %v96_v45  ;;  %v116_v51 = vsub.s32 %v113_v46, %v96_v45  ;;  %v148_v7 = vstv %s241_s2 }
   0xb   :  { %31 = vadd.xlane.f32.xlu0 %v30_v10 }
   0xc   :  { %44 = vadd.xlane.f32.xlu1 %v43_v11 }
   0xf   :  { %35 = vadd.xlane.f32.xlu0 %v34_v14 }
  0x10   :  { %47 = vadd.xlane.f32.xlu1 %v46_v15 }
  0x8c   :  { %v26_v18 = vpop.xlane.xlu0 %25 }
  0x8d   :  { %v53_v19 = vmul.f32 %v49_v17, %v26_v18  ;;  %v39_v21 = vpop.xlane.xlu1 %38 }
  0x8e   :  { %v57_v24 = vmul.f32 %v49_v17, %v39_v21 }
  0x8f   :  { %70 = vperm.xlu0 %164, %v53_v19  }
  0x90   :  { %v29_v22 = vpop.xlane.xlu0 %28 }
  0x91   :  { %v54_v23 = vmul.f32 %v50_v20, %v29_v22  ;;  %v42_v25 = vpop.xlane.xlu1 %41 }
  0x92   :  { %v58_v26 = vmul.f32 %v50_v20, %v42_v25 }
  0x93   :  { %73 = vperm.xlu1 %165, %v54_v23  }
  0x94   :  { %v32_v28 = vpop.xlane.xlu0 %31 }
  0x95   :  { %v55_v29 = vmul.f32 %v51_v27, %v32_v28  ;;  %v45_v30 = vpop.xlane.xlu1 %44 }
  0x96   :  { %v59_v31 = vmul.f32 %v51_v27, %v45_v30 }
  0x97   :  { %82 = vperm.xlu1 %165, %v57_v24  }
  0x98   :  { %v36_v33 = vpop.xlane.xlu0 %35 }
  0x99   :  { %v56_v34 = vmul.f32 %v52_v32, %v36_v33  ;;  %v48_v35 = vpop.xlane.xlu1 %47 }
  0x9a   :  { %v60_v36 = vmul.f32 %v52_v32, %v48_v35 }
  0x9b   :  { %85 = vperm.xlu1 %165, %v58_v26  }
  0x9f   :  { %76 = vperm.xlu1 %165, %v55_v29  }
  0xa3   :  { %88 = vperm.xlu1 %165, %v59_v31  }
  0xa7   :  { %79 = vperm.xlu1 %165, %v56_v34  }
  0xab   :  { %91 = vperm.xlu1 %165, %v60_v36  }
 0x10a   :  { %v71_v52 = vpop.permute.xlu0 %70 }
 0x10b   :  { %v98_v58 = vrot.slane %v71_v52, %v97_v50 }
 0x10e   :  { %v74_v37 = vpop.permute.xlu1 %73 }
 0x10f   :  { %v103_v54 = vrot.slane %v74_v37, %v102_v48 }
 0x111   :  { %v105_v62 = vsel %vm104_vm2, %v103_v54, %v98_v58 }
 0x112   :  { %v83_v38 = vpop.permute.xlu1 %82 }
 0x113   :  { %v123_v59 = vrot.slane %v83_v38, %v97_v50 }
 0x116   :  { %v86_v40 = vpop.permute.xlu1 %85 }
 0x117   :  { %v127_v55 = vrot.slane %v86_v40, %v102_v48 }
 0x119   :  { %v128_v63 = vsel %vm104_vm2, %v127_v55, %v123_v59 }
 0x11a   :  { %v77_v42 = vpop.permute.xlu1 %76 }
 0x11b   :  { %v110_v56 = vrot.slane %v77_v42, %v109_v49 }
 0x11d   :  { %v112_v1 = vsel %vm111_vm3, %v110_v56, %v105_v62 }
 0x11e   :  { %v89_v47 = vpop.permute.xlu1 %88 }
 0x11f   :  { %v132_v57 = vrot.slane %v89_v47, %v109_v49 }
 0x121   :  { %v133_v2 = vsel %vm111_vm3, %v132_v57, %v128_v63 }
 0x122   :  { %v80_v53 = vpop.permute.xlu1 %79 }
 0x123   :  { %v117_v60 = vrot.slane %v80_v53, %v116_v51 }
 0x125   :  { %v119_v3 = vsel %vm118_vm4, %v117_v60, %v112_v1 }
 0x126   :  { %v92_v61 = vpop.permute.xlu1 %91 }
 0x127   :  { %v137_v0 = vrot.slane %v92_v61, %v116_v51 }
 0x129   :  { %v138_v4 = vsel %vm118_vm4, %v137_v0, %v133_v2 }
 0x12a   :  { %v140_v5 = vsel %vm139_vm5, %v138_v4, %v119_v3 }
 0x12b   :  { %v143_v6 = vsel %vm142_vm6, %v140_v5, 0.0 }
 0x12c   :  { %144 = vadd.xlane.f32.xlu1 %v143_v6 }
 0x1b5   :  { %v145_v8 = vpop.xlane.xlu1 %144 }
 0x1b6   :  { %v146_v9 = vmul.f32 0.0625, %v145_v8 }
 0x1b8   :  { %v149_v10 = vadd.f32 %v148_v7, %v146_v9 }
 0x1ba   :  { %v162_v11 = vmul.f32 -1.442695, %v149_v10 }
 0x1bc   :  { %166 = vpow2.f32 %v162_v11 }
 0x1c9   :  { %v167_v12 = vpop.eup %166 }
 0x1ca   :  { %v153_v13 = vadd.f32 1.0, %v167_v12 }
 0x1cc   :  { %168 = vrcp.f32 %v153_v13 }
 0x1d9   :  { %v169_v14 = vpop.eup %168 }
 0x1da   :  { %157 = vst.msk [vmem:[%s242_s3] sm:$0x3] %vm156_vm7, %v169_v14 }

</bundles_post_ra>
